<compile_context>
chip_gen: v6e
topology: v6e:2x2x1
jax: 0.10.0
libtpu: 0.0.40
codegen_flags: <defaults>
</compile_context>

<pallas_src>
import functools

import jax
import jax.numpy as jnp
from jax.experimental import pallas as pl
from jax.experimental.pallas import tpu as pltpu

NEG_BIAS = -1e30  # finite "masked" bias (avoids -inf - -inf = NaN on empty rows)


# ---------------------------------------------------------------------------
# Kernel: one (batch, query-tile) grid cell of all-head attention + out-proj.
# ---------------------------------------------------------------------------
def _mha_core_kernel(*refs, has_mask):
    if has_mask:
        q_ref, k_ref, v_ref, bias_ref, wo_ref, bo_ref, y_ref, attn_ref = refs
    else:
        q_ref, k_ref, v_ref, wo_ref, bo_ref, y_ref, attn_ref = refs
        bias_ref = None

    q = q_ref[0]          # (H, tq, hd) bf16, already scaled by hd**-0.5
    k = k_ref[0]          # (H, T,  hd) bf16
    v = v_ref[0]          # (H, T,  hd) bf16

    # All-head Q K^T (batched over heads), f32 accumulation: (H, tq, T).
    dots = jax.lax.dot_general(q, k, (((2,), (2,)), ((0,), (0,))),
                               preferred_element_type=jnp.float32)
    if has_mask:
        dots = dots + bias_ref[0].astype(jnp.float32)[None, :, :]

    # Softmax in f32; reciprocal goes to the EUP slot (frees VALU).
    m = jnp.max(dots, axis=-1, keepdims=True)
    e = jnp.exp(dots - m)
    denom = jnp.sum(e, axis=-1, keepdims=True)
    attn = e * pl.reciprocal(denom, approx=True)          # (H, tq, T)
    attn_ref[0] = attn.astype(attn_ref.dtype)

    # attn @ V per head (batched): (H, tq, hd), f32 accumulation.
    yh = jax.lax.dot_general(attn.astype(jnp.bfloat16), v,
                             (((2,), (1,)), ((0,), (0,))),
                             preferred_element_type=jnp.float32)

    # Fused output projection with NO head-merge transpose:
    # per-head (tq, hd) @ (hd, E), then summed over heads.
    yo = jax.lax.dot_general(yh.astype(jnp.bfloat16), wo_ref[...],
                             (((2,), (1,)), ((0,), (0,))),
                             preferred_element_type=jnp.float32)  # (H, tq, E)
    y_ref[0] = jnp.sum(yo, axis=0) + bo_ref[...]


# ---------------------------------------------------------------------------
# Chip-aware VMEM budget and VMEM-aware query-tile selection.
# ---------------------------------------------------------------------------
def _vmem_limit_bytes():
    cap = 128 * 1024 * 1024
    try:
        info = pltpu.get_tpu_info()
        cap = int(getattr(info, "vmem_capacity_bytes", cap))
    except Exception:
        pass
    if cap <= 64 * 1024 * 1024:
        return 52 * 1024 * 1024      # v7x: leave headroom inside 64 MiB physical
    return 100 * 1024 * 1024         # v5e / v6e: 128 MiB physical


def _pick_q_tile(S, T, H, hd, E, attn_bytes, has_mask, vmem_limit):
    # Bytes that do not scale with tq: K + V (bf16, double-buffered) + weights.
    const_b = 2 * (2 * H * T * hd * 2) + 2 * (H * hd * E * 2) + 2 * (E * 4)
    # Bytes per query row: attn-out block (x2 buffers) + f32 softmax temps
    # (dots / e / attn) + q block (x2) + y block (x2) [+ bf16 bias (x2)].
    per_row = (H * T * attn_bytes * 2
               + H * T * 4 * 3
               + H * hd * 2 * 2
               + E * 4 * 2)
    if has_mask:
        per_row += T * 2 * 2
    budget = vmem_limit - const_b - (6 << 20)   # headroom for compiler scratch
    tq_cap = max(budget // per_row, 8) if budget > 0 else 8
    for t in (1024, 512, 256, 128, 64, 32, 16, 8):
        if t <= tq_cap and S % t == 0 and t < S:
            return t
    return S


# ---------------------------------------------------------------------------
# Wrapper: equivalent of PyTorchAttention.forward.
# ---------------------------------------------------------------------------
def pytorch_attention_forward(x, context=None, mask=None, *, params, num_heads,
                              attn_dtype=jnp.float32):
    """x: (B,S,E) f32; context: (B,T,Dc) f32 or None; mask bool (S,T)/(B,S,T),
    True = attend.  Returns (y (B,S,E) f32, attn (B,H,S,T) attn_dtype)."""
    if context is None:
        context = x
    x = jnp.asarray(x, jnp.float32)
    context = jnp.asarray(context, jnp.float32)
    B, S, E = x.shape
    T = context.shape[1]
    H = num_heads
    if E % H != 0:
        raise ValueError("model_dim must be divisible by num_heads")
    hd = E // H
    scale = float(hd) ** -0.5

    # ---- Projections hoisted to XLA (computed once, full MXU width). ----
    q = jnp.einsum('bse,oe->bso', x, params['wq']) + params['bq']
    k = jnp.einsum('btc,oc->bto', context, params['wk']) + params['bk']
    v = jnp.einsum('btc,oc->bto', context, params['wv']) + params['bv']
    q = q * scale

    # Head-major bf16 layout for the kernel (split done once in XLA).
    q4 = jnp.transpose(q.reshape(B, S, H, hd), (0, 2, 1, 3)).astype(jnp.bfloat16)
    k4 = jnp.transpose(k.reshape(B, T, H, hd), (0, 2, 1, 3)).astype(jnp.bfloat16)
    v4 = jnp.transpose(v.reshape(B, T, H, hd), (0, 2, 1, 3)).astype(jnp.bfloat16)

    # Pre-transposed per-head output projection weight: (H, hd, E) bf16.
    wo_heads = jnp.transpose(params['wo'], (1, 0)).reshape(H, hd, E).astype(jnp.bfloat16)
    bo = jnp.asarray(params['bo'], jnp.float32).reshape(1, E)

    # ---- Mask -> additive bf16 bias (only when a mask is given). ----
    has_mask = mask is not None
    if has_mask:
        m = jnp.asarray(mask)
        if m.ndim == 2:
            m = m[None]
        bias = jnp.where(m, 0.0, NEG_BIAS).astype(jnp.bfloat16)
        per_batch_bias = bias.shape[0] != 1

    vmem_limit = _vmem_limit_bytes()
    attn_bytes = jnp.dtype(attn_dtype).itemsize
    tq = _pick_q_tile(S, T, H, hd, E, attn_bytes, has_mask, vmem_limit)
    nq = max(S // tq, 1)

    qmap = lambda b, s: (b, 0, s, 0)
    kvmap = lambda b, s: (b, 0, 0, 0)     # constant in s -> fetched once per batch
    const2 = lambda b, s: (0, 0)
    const3 = lambda b, s: (0, 0, 0)

    in_specs = [
        pl.BlockSpec((1, H, tq, hd), qmap),     # Q tile (bf16)
        pl.BlockSpec((1, H, T, hd), kvmap),     # K (bf16, full keys)
        pl.BlockSpec((1, H, T, hd), kvmap),     # V (bf16, full keys)
    ]
    args = [q4, k4, v4]
    if has_mask:
        bmap = (lambda b, s: (b, s, 0)) if per_batch_bias else (lambda b, s: (0, s, 0))
        in_specs.append(pl.BlockSpec((1, tq, T), bmap))   # bf16 additive bias
        args.append(bias)
    in_specs += [
        pl.BlockSpec((H, hd, E), const3),       # per-head out-proj weight (bf16)
        pl.BlockSpec((1, E), const2),           # out-proj bias (f32)
    ]
    args += [wo_heads, bo]

    out_specs = [
        pl.BlockSpec((1, tq, E), lambda b, s: (b, s, 0)),
        pl.BlockSpec((1, H, tq, T), lambda b, s: (b, 0, s, 0)),
    ]

    y, attn = pl.pallas_call(
        functools.partial(_mha_core_kernel, has_mask=has_mask),
        out_shape=(jax.ShapeDtypeStruct((B, S, E), jnp.float32),
                   jax.ShapeDtypeStruct((B, H, S, T), attn_dtype)),
        grid_spec=pltpu.PrefetchScalarGridSpec(
            num_scalar_prefetch=0,
            grid=(B, nq),
            in_specs=in_specs,
            out_specs=out_specs,
        ),
        compiler_params=pltpu.CompilerParams(
            dimension_semantics=("parallel", "parallel"),
            vmem_limit_bytes=vmem_limit,
        ),
    )(*args)
    return y, attn


# ---------------------------------------------------------------------------
# Parameter init (PyTorch (out_features, in_features) layout) and f32 reference.
# ---------------------------------------------------------------------------
def init_mha_params(key, model_dim, context_dim=None, num_heads=8):
    E = model_dim
    Dc = E if context_dim is None else context_dim
    k0, k1, k2, k3 = jax.random.split(key, 4)
    s = 0.02
    return dict(
        wq=s * jax.random.normal(k0, (E, E), jnp.float32),   # q_proj.weight
        wk=s * jax.random.normal(k1, (E, Dc), jnp.float32),  # k_proj.weight
        wv=s * jax.random.normal(k2, (E, Dc), jnp.float32),  # v_proj.weight
        wo=s * jax.random.normal(k3, (E, E), jnp.float32),   # out_proj.weight
        bq=jnp.zeros((1, E), jnp.float32),
        bk=jnp.zeros((1, E), jnp.float32),
        bv=jnp.zeros((1, E), jnp.float32),
        bo=jnp.zeros((1, E), jnp.float32),
    )


def _reference_forward(x, context, mask, params, H):
    """Pure f32 JAX reference of the same forward pass."""
    if context is None:
        context = x
    B, S, E = x.shape
    T = context.shape[1]
    hd = E // H
    q = jnp.einsum('bse,oe->bso', x, params['wq']) + params['bq']
    k = jnp.einsum('btc,oc->bto', context, params['wk']) + params['bk']
    v = jnp.einsum('btc,oc->bto', context, params['wv']) + params['bv']
    q = jnp.transpose(q.reshape(B, S, H, hd), (0, 2, 1, 3)) * (float(hd) ** -0.5)
    k = jnp.transpose(k.reshape(B, T, H, hd), (0, 2, 1, 3))
    v = jnp.transpose(v.reshape(B, T, H, hd), (0, 2, 1, 3))
    dots = jnp.einsum('bhsd,bhtd->bhst', q, k)
    if mask is not None:
        m = jnp.asarray(mask)
        if m.ndim == 2:
            m = m[None]
        dots = dots + jnp.where(m, 0.0, NEG_BIAS)[:, None]
    attn = jax.nn.softmax(dots, axis=-1)
    yh = jnp.einsum('bhst,bhtd->bhsd', attn, v)
    y = jnp.transpose(yh, (0, 2, 1, 3)).reshape(B, S, E)
    y = jnp.einsum('bse,oe->bso', y, params['wo']) + params['bo']
    return y, attn


if __name__ == "__main__":
    # TODO(synk): attention_dropout path omitted (p=0.0 / eval-mode reference usage).
    model_dim, num_heads = 32, 8
    batch, seq = 2, 8

    key = jax.random.PRNGKey(0)
    pkey, xkey, ckey, cxkey = jax.random.split(key, 4)
    params = init_mha_params(pkey, model_dim, num_heads=num_heads)
    x = jax.random.normal(xkey, (batch, seq, model_dim), jnp.float32)

    # Self-attention with a causal (lower-triangular) boolean mask: True = attend.
    causal_mask = jnp.tril(jnp.ones((seq, seq), dtype=bool))
    y, attn = pytorch_attention_forward(x, context=None, mask=causal_mask,
                                        params=params, num_heads=num_heads)
    # Unmasked self-attention (bias stream fully elided in this specialization).
    y2, attn2 = pytorch_attention_forward(x, context=None, mask=None,
                                          params=params, num_heads=num_heads)
    # Cross-attention with a different context_dim (kdim/vdim path).
    ctx_dim, ctx_len = 16, 16
    xparams = init_mha_params(ckey, model_dim, context_dim=ctx_dim,
                              num_heads=num_heads)
    ctx = jax.random.normal(cxkey, (batch, ctx_len, ctx_dim), jnp.float32)
    y3, attn3 = pytorch_attention_forward(x, context=ctx, mask=None,
                                          params=xparams, num_heads=num_heads)

    jax.block_until_ready((y, attn, y2, attn2, y3, attn3))

    assert y.shape == (batch, seq, model_dim)
    assert attn.shape == (batch, num_heads, seq, seq)
    assert y3.shape == (batch, seq, model_dim)
    assert attn3.shape == (batch, num_heads, seq, ctx_len)
    assert bool(jnp.all(jnp.isfinite(y))) and bool(jnp.all(jnp.isfinite(attn)))

    # Softmax rows sum to ~1 (bf16 matmuls + approx reciprocal -> loose tol).
    assert bool(jnp.allclose(attn.sum(-1), 1.0, atol=1e-2))
    assert bool(jnp.allclose(attn2.sum(-1), 1.0, atol=1e-2))
    assert bool(jnp.allclose(attn3.sum(-1), 1.0, atol=1e-2))

    # Causal mask: strictly upper-triangular attention weights are ~0.
    upper = jnp.triu(jnp.ones((seq, seq), jnp.float32), k=1)
    assert float(jnp.max(jnp.abs(attn * upper[None, None]))) < 1e-6

    # Numerical parity against the pure-f32 JAX reference.
    yr, ar = _reference_forward(x, None, causal_mask, params, num_heads)
    y2r, a2r = _reference_forward(x, None, None, params, num_heads)
    y3r, a3r = _reference_forward(x, ctx, None, xparams, num_heads)
    assert bool(jnp.allclose(y, yr, atol=1e-2)) and bool(jnp.allclose(attn, ar, atol=1e-2))
    assert bool(jnp.allclose(y2, y2r, atol=1e-2)) and bool(jnp.allclose(attn2, a2r, atol=1e-2))
    assert bool(jnp.allclose(y3, y3r, atol=1e-2)) and bool(jnp.allclose(attn3, a3r, atol=1e-2))

    print("KERNEL_OK")
</pallas_src>

<mosaic_0001>
module attributes {stable_mosaic.version = 11 : i64} {
  func.func @_mha_core_kernel(%arg0: i32, %arg1: i32, %arg2: memref<1x8x8x4xbf16, #tpu.memory_space<vmem>>, %arg3: memref<1x8x8x4xbf16, #tpu.memory_space<vmem>>, %arg4: memref<1x8x8x4xbf16, #tpu.memory_space<vmem>>, %arg5: memref<1x8x8xbf16, #tpu.memory_space<vmem>>, %arg6: memref<8x4x32xbf16, #tpu.memory_space<vmem>>, %arg7: memref<1x32xf32, #tpu.memory_space<vmem>>, %arg8: memref<1x8x32xf32, #tpu.memory_space<vmem>>, %arg9: memref<1x8x8x8xf32, #tpu.memory_space<vmem>>) attributes {dimension_semantics = [#tpu.dimension_semantics<parallel>, #tpu.dimension_semantics<parallel>], iteration_bounds = array<i64: 2, 1>, scalar_prefetch = 0 : i64, scratch_operands = 0 : i64, tpu.core_type = #tpu.core_type<tc>, window_params = [{transform_indices = @transform_0, window_bounds = array<i64: 1, 8, 8, 4>}, {transform_indices = @transform_1, window_bounds = array<i64: 1, 8, 8, 4>}, {transform_indices = @transform_2, window_bounds = array<i64: 1, 8, 8, 4>}, {transform_indices = @transform_3, window_bounds = array<i64: 1, 8, 8>}, {pipeline_mode = #tpu.pipeline_mode<synchronous>, transform_indices = @transform_4, window_bounds = array<i64: 8, 4, 32>}, {pipeline_mode = #tpu.pipeline_mode<synchronous>, transform_indices = @transform_5, window_bounds = array<i64: 1, 32>}, {transform_indices = @transform_6, window_bounds = array<i64: 1, 8, 32>}, {transform_indices = @transform_7, window_bounds = array<i64: 1, 8, 8, 8>}]} {
    %c0 = arith.constant 0 : index
    %c0_0 = arith.constant 0 : index
    %c0_1 = arith.constant 0 : index
    %c0_2 = arith.constant 0 : index
    %0 = vector.load %arg2[%c0, %c0_0, %c0_1, %c0_2] : memref<1x8x8x4xbf16, #tpu.memory_space<vmem>>, vector<1x8x8x4xbf16>
    %1 = vector.shape_cast %0 : vector<1x8x8x4xbf16> to vector<8x8x4xbf16>
    %c0_3 = arith.constant 0 : index
    %c0_4 = arith.constant 0 : index
    %c0_5 = arith.constant 0 : index
    %c0_6 = arith.constant 0 : index
    %2 = vector.load %arg3[%c0_3, %c0_4, %c0_5, %c0_6] : memref<1x8x8x4xbf16, #tpu.memory_space<vmem>>, vector<1x8x8x4xbf16>
    %3 = vector.shape_cast %2 : vector<1x8x8x4xbf16> to vector<8x8x4xbf16>
    %c0_7 = arith.constant 0 : index
    %c0_8 = arith.constant 0 : index
    %c0_9 = arith.constant 0 : index
    %c0_10 = arith.constant 0 : index
    %4 = vector.load %arg4[%c0_7, %c0_8, %c0_9, %c0_10] : memref<1x8x8x4xbf16, #tpu.memory_space<vmem>>, vector<1x8x8x4xbf16>
    %5 = vector.shape_cast %4 : vector<1x8x8x4xbf16> to vector<8x8x4xbf16>
    %cst = arith.constant dense<0.000000e+00> : vector<8x8x8xf32>
    %6 = tpu.matmul %1, %3, %cst {dimension_numbers = #tpu.dot_dimension_numbers<[2], [2], [1], [1], [0, 0, 0, 1, 1, 1], [0], [0]>} : vector<8x8x4xbf16>, vector<8x8x4xbf16>, vector<8x8x8xf32> -> vector<8x8x8xf32>
    %c0_11 = arith.constant 0 : index
    %c0_12 = arith.constant 0 : index
    %c0_13 = arith.constant 0 : index
    %7 = vector.load %arg5[%c0_11, %c0_12, %c0_13] : memref<1x8x8xbf16, #tpu.memory_space<vmem>>, vector<1x8x8xbf16>
    %8 = vector.shape_cast %7 : vector<1x8x8xbf16> to vector<8x8xbf16>
    %9 = arith.extf %8 : vector<8x8xbf16> to vector<8x8xf32>
    %10 = vector.shape_cast %9 : vector<8x8xf32> to vector<1x8x8xf32>
    %11 = vector.broadcast %10 : vector<1x8x8xf32> to vector<8x8x8xf32>
    %12 = arith.addf %6, %11 : vector<8x8x8xf32>
    %cst_14 = arith.constant dense<0xFF800000> : vector<8x8xf32>
    %13 = vector.multi_reduction <maximumf>, %12, %cst_14 [2] : vector<8x8x8xf32> to vector<8x8xf32>
    %14 = vector.shape_cast %13 : vector<8x8xf32> to vector<8x8x1xf32>
    %15 = vector.broadcast %14 : vector<8x8x1xf32> to vector<8x8x8xf32>
    %16 = arith.subf %12, %15 : vector<8x8x8xf32>
    %17 = math.exp %16 : vector<8x8x8xf32>
    %cst_15 = arith.constant dense<0.000000e+00> : vector<8x8xf32>
    %18 = vector.multi_reduction <add>, %17, %cst_15 [2] : vector<8x8x8xf32> to vector<8x8xf32>
    %19 = vector.shape_cast %18 : vector<8x8xf32> to vector<8x8x1xf32>
    %20 = tpu.reciprocal %19 {approx = true} : vector<8x8x1xf32> -> vector<8x8x1xf32>
    %21 = vector.broadcast %20 : vector<8x8x1xf32> to vector<8x8x8xf32>
    %22 = arith.mulf %17, %21 : vector<8x8x8xf32>
    %c0_16 = arith.constant 0 : index
    %c0_17 = arith.constant 0 : index
    %c0_18 = arith.constant 0 : index
    %c0_19 = arith.constant 0 : index
    %23 = vector.load %arg9[%c0_16, %c0_17, %c0_18, %c0_19] : memref<1x8x8x8xf32, #tpu.memory_space<vmem>>, vector<1x8x8x8xf32>
    %24 = vector.shape_cast %23 : vector<1x8x8x8xf32> to vector<8x8x8xf32>
    %25 = vector.shape_cast %22 : vector<8x8x8xf32> to vector<1x8x8x8xf32>
    tpu.vector_store %arg9[%c0_16, %c0_17, %c0_18, %c0_19], %25 {strides = array<i32>} : memref<1x8x8x8xf32, #tpu.memory_space<vmem>>, vector<1x8x8x8xf32>,
    %26 = arith.truncf %22 : vector<8x8x8xf32> to vector<8x8x8xbf16>
    %cst_20 = arith.constant dense<0.000000e+00> : vector<8x8x4xf32>
    %27 = tpu.matmul %26, %5, %cst_20 {dimension_numbers = #tpu.dot_dimension_numbers<[2], [1], [1], [2], [0, 0, 0, 1, 1, 2], [0], [0]>} : vector<8x8x8xbf16>, vector<8x8x4xbf16>, vector<8x8x4xf32> -> vector<8x8x4xf32>
    %28 = arith.truncf %27 : vector<8x8x4xf32> to vector<8x8x4xbf16>
    %c0_21 = arith.constant 0 : index
    %c0_22 = arith.constant 0 : index
    %c0_23 = arith.constant 0 : index
    %29 = vector.load %arg6[%c0_21, %c0_22, %c0_23] : memref<8x4x32xbf16, #tpu.memory_space<vmem>>, vector<8x4x32xbf16>
    %cst_24 = arith.constant dense<0.000000e+00> : vector<8x8x32xf32>
    %30 = tpu.matmul %28, %29, %cst_24 {dimension_numbers = #tpu.dot_dimension_numbers<[2], [1], [1], [2], [0, 0, 0, 1, 1, 2], [0], [0]>} : vector<8x8x4xbf16>, vector<8x4x32xbf16>, vector<8x8x32xf32> -> vector<8x8x32xf32>
    %cst_25 = arith.constant dense<0.000000e+00> : vector<8x32xf32>
    %31 = vector.multi_reduction <add>, %30, %cst_25 [0] : vector<8x8x32xf32> to vector<8x32xf32>
    %c0_26 = arith.constant 0 : index
    %c0_27 = arith.constant 0 : index
    %32 = vector.load %arg7[%c0_26, %c0_27] : memref<1x32xf32, #tpu.memory_space<vmem>>, vector<1x32xf32>
    %33 = vector.broadcast %32 : vector<1x32xf32> to vector<8x32xf32>
    %34 = arith.addf %31, %33 : vector<8x32xf32>
    %c0_28 = arith.constant 0 : index
    %c0_29 = arith.constant 0 : index
    %c0_30 = arith.constant 0 : index
    %35 = vector.load %arg8[%c0_28, %c0_29, %c0_30] : memref<1x8x32xf32, #tpu.memory_space<vmem>>, vector<1x8x32xf32>
    %36 = vector.shape_cast %35 : vector<1x8x32xf32> to vector<8x32xf32>
    %37 = vector.shape_cast %34 : vector<8x32xf32> to vector<1x8x32xf32>
    tpu.vector_store %arg8[%c0_28, %c0_29, %c0_30], %37 {strides = array<i32>} : memref<1x8x32xf32, #tpu.memory_space<vmem>>, vector<1x8x32xf32>,
    return
  }
  func.func @transform_0(%arg0: i32, %arg1: i32) -> (i32, i32, i32, i32) {
    %c0_i32 = arith.constant 0 : i32
    %c0_i32_0 = arith.constant 0 : i32
    %c0_i32_1 = arith.constant 0 : i32
    return %arg0, %c0_i32, %arg1, %c0_i32_0 : i32, i32, i32, i32
  }
  func.func @transform_1(%arg0: i32, %arg1: i32) -> (i32, i32, i32, i32) {
    %c0_i32 = arith.constant 0 : i32
    %c0_i32_0 = arith.constant 0 : i32
    %c0_i32_1 = arith.constant 0 : i32
    %c0_i32_2 = arith.constant 0 : i32
    return %arg0, %c0_i32, %c0_i32_0, %c0_i32_1 : i32, i32, i32, i32
  }
  func.func @transform_2(%arg0: i32, %arg1: i32) -> (i32, i32, i32, i32) {
    %c0_i32 = arith.constant 0 : i32
    %c0_i32_0 = arith.constant 0 : i32
    %c0_i32_1 = arith.constant 0 : i32
    %c0_i32_2 = arith.constant 0 : i32
    return %arg0, %c0_i32, %c0_i32_0, %c0_i32_1 : i32, i32, i32, i32
  }
  func.func @transform_3(%arg0: i32, %arg1: i32) -> (i32, i32, i32) {
    %c0_i32 = arith.constant 0 : i32
    %c0_i32_0 = arith.constant 0 : i32
    %c0_i32_1 = arith.constant 0 : i32
    return %c0_i32, %arg1, %c0_i32_0 : i32, i32, i32
  }
  func.func @transform_4(%arg0: i32, %arg1: i32) -> (i32, i32, i32) {
    %c0_i32 = arith.constant 0 : i32
    %c0_i32_0 = arith.constant 0 : i32
    %c0_i32_1 = arith.constant 0 : i32
    %c0_i32_2 = arith.constant 0 : i32
    return %c0_i32, %c0_i32_0, %c0_i32_1 : i32, i32, i32
  }
  func.func @transform_5(%arg0: i32, %arg1: i32) -> (i32, i32) {
    %c0_i32 = arith.constant 0 : i32
    %c0_i32_0 = arith.constant 0 : i32
    %c0_i32_1 = arith.constant 0 : i32
    return %c0_i32, %c0_i32_0 : i32, i32
  }
  func.func @transform_6(%arg0: i32, %arg1: i32) -> (i32, i32, i32) {
    %c0_i32 = arith.constant 0 : i32
    %c0_i32_0 = arith.constant 0 : i32
    return %arg0, %arg1, %c0_i32 : i32, i32, i32
  }
  func.func @transform_7(%arg0: i32, %arg1: i32) -> (i32, i32, i32, i32) {
    %c0_i32 = arith.constant 0 : i32
    %c0_i32_0 = arith.constant 0 : i32
    %c0_i32_1 = arith.constant 0 : i32
    return %arg0, %c0_i32, %arg1, %c0_i32_0 : i32, i32, i32, i32
  }
}

</mosaic_0001>

<bundles_post_ra>
// kernel: tpu_custom_call.1
= control target key start
LH: loop header
LB: loop body
LE: loop exit
PB: predicated region body
PF: predicated region fallthrough
CT: control target
= control target key end

     0   :  { %13 = vsyncpa [#allocation3], 0  ;;  %s2729_s0 = inlined_call_operand.vmem [shape: bf16[2,8,8,4], index: 0, kind: input, shape index: {}]   ;;  %s2730_s1 = inlined_call_operand.vmem [shape: bf16[2,8,8,4], index: 1, kind: input, shape index: {}]   ;;  %s2731_s2 = inlined_call_operand.vmem [shape: bf16[2,8,8,4], index: 2, kind: input, shape index: {}]   ;;  %s2732_s3 = inlined_call_operand.vmem [shape: bf16[1,8,8], index: 3, kind: input, shape index: {}]   ;;  %s2733_s4 = inlined_call_operand.vmem [shape: bf16[8,4,32], index: 4, kind: input, shape index: {}]   ;;  %s2734_s5 = inlined_call_operand.vmem [shape: f32[1,32], index: 5, kind: input, shape index: {}]   ;;  %s2735_s6 = inlined_call_operand.hbm [shape: f32[2,8,32], index: 6, kind: output, shape index: {0}]   ;;  %s2736_s7 = inlined_call_operand.hbm [shape: f32[2,8,8,8], index: 7, kind: output, shape index: {1}]  }
   0x1   :  { %15 = vsyncpa [#allocation3 + $0x1], 0 }
   0x2   :  { %16 = vsyncpa [#allocation5], 0 }
   0x3   :  { %18 = vsyncpa [#allocation5 + $0x1], 0  ;;  %s2328_s24 = smov 0   ;;  %s2330_s25 = smov 0  }
   0x4   :  { %s2332_s26 = smov 0   ;;  %s2334_s27 = smov 0  }
   0x5   :  { %s2336_s28 = smov 0   ;;  %s2338_s29 = smov 0  }
   0x6 LB: > { %s1836_s30 = sadd.s32 4294967295, %s2280_s29   ;;  %s1837_s8 = sadd.s32 4294967294, %s2280_s29   ;;  %s2280_s29 = sphi %s2338_s29, %s24_s29   ;;  %s2276_s28 = sphi %s2336_s28, %s2743_s28   ;;  %s2272_s27 = sphi %s2334_s27, %s2742_s27   ;;  %s2268_s26 = sphi %s2332_s26, %s2741_s26   ;;  %s2264_s25 = sphi %s2330_s25, %s2740_s25   ;;  %s2260_s24 = sphi %s2328_s24, %s2739_s24  }
   0x7   : > { %s36_s9 = sadd.s32 1, %s2276_s28  ;;  %s193_s10 = sadd.s32 1, %s2268_s26 }
   0x8   : > { %p38_p0 = scmp.ge.s32.totalorder %s36_s9, 2  ;;  %p203_p1 = scmp.ne.s32.totalorder %s2268_s26, %s2264_s25 }
   0x9   : > { %p204_p2 = scmp.eq.s32.totalorder %s1836_s30, 1  ;;  %p209_p3 = scmp.ne.s32.totalorder %s2264_s25, %s2260_s24 }
   0xa   : > { %s2745_s9 = smov (%p38_p0, %s36_s9), 0  ;;  %p210_p5 = scmp.eq.s32.totalorder %s1837_s8, 1 }
   0xb   : > { %p2368_p4 = por %p204_p2, %p203_p1  ;;  %s188_s12 = ssub.s32 %s2276_s28, %s2745_s9 }
   0xc   : > { %p1841_p6 = scmp.ge.s32.totalorder %s2280_s29, 1  ;;  %p191_p7 = scmp.eq.s32.totalorder %s188_s12, 0 }
   0xd   : > { %p2375_p8 = por %p210_p5, %p209_p3  ;;  %p296_p9 = scmp.lt.s32.totalorder %s2280_s29, 3 }
   0xe   : > { %s2381_s14 = scalar_select %p191_p7, %s2268_s26, %s193_s10  }
   0xf   : > { %p297_p10 = pnand %p1841_p6, %p296_p9 }
  0x10   : > { %p350_p11 = scmp.lt.s32.totalorder (!%p297_p10), %s2272_s27, 1  ;;  %s1885_s30 = sshll.u32 (!%p297_p10), %s2272_s27, 10 }
  0x11   : > { %300 = sbr.rel (%p297_p10) target bundleno = 978 (0x3d2), region = 44 }
  0x16   : > { %v2282_v0 = vmov 0.0   ;;  %s351_s15 = scalar_select %p350_p11, %s2272_s27, 1  ;;  %vm2283_vm0 = vmmov 0   ;;  %vm399_vm1 = vcmask 31744   ;;  %v397_v25 = vld [vmem:[%s2732_s3] sm:$0xf] }
  0x17   : > { %1934 = vmatprep.subr.bf16.mxu0 %v2282_v0  ;;  %1940 = vmatprep.subr.bf16.mxu1 %v2282_v0  ;;  %v398_v26 = vunpack.c.l.bf16 %v397_v25  ;;  %vm768_vm2 = vcmask 64512   ;;  %vm876_vm3 = vcmask 1043456   ;;  %vm1261_vm4 = vcmask 1041408  }
  0x18   : > { %1936 = vmatprep.mubr.msk.bf16.mxu0 %vm2283_vm0, %v2282_v0  ;;  %1942 = vmatprep.mubr.msk.bf16.mxu1 %vm2283_vm0, %v2282_v0  ;;  %s2391_s16 = sshll.u32 %s351_s15, 5  ;;  %s2521_s15 = sand.u32 1, %s2264_s25  }
  0x19   : > { %s2397_s19 = scalar_lea.vmem %s2730_s1, %s2391_s16  ;;  %s2407_s22 = scalar_lea.vmem %s2729_s0, %s2391_s16 }
  0x1a   : > { %v381_v1 = vld [vmem:[%s2397_s19] sm:$0xf]  ;;  %v382_v2 = vld [vmem:[%s2397_s19 + $0x4] sm:$0xf]  ;;  %v383_v5 = vld [vmem:[%s2397_s19 + $0x8] sm:$0xf]  ;;  %s367_s12 = scalar_lea.vmem %s2731_s2, %s2391_s16 }
  0x1b   : > { %v404_v3 = vsel %vm399_vm1, %v381_v1, 0  ;;  %v450_v4 = vsel %vm399_vm1, %v382_v2, 0  ;;  %v384_v6 = vld [vmem:[%s2397_s19 + $0xc] sm:$0xf]  ;;  %v373_v7 = vld [vmem:[%s2407_s22] sm:$0xf] }
  0x1c   : > { %1935 = vmatpush3.bf16.xpose.msra.mxu0 %v404_v3  ;;  %1941 = vmatpush3.bf16.xpose.msra.mxu1 %v450_v4  ;;  %v374_v8 = vld [vmem:[%s2407_s22 + $0x4] sm:$0xf]  ;;  %v496_v9 = vsel %vm399_vm1, %v383_v5, 0  ;;  %v542_v10 = vsel %vm399_vm1, %v384_v6, 0  ;;  %v385_v11 = vld [vmem:[%s2397_s19 + $0x10] sm:$0xf] }
  0x1d   : > { %1946 = vmatprep.subr.bf16.mxu0 %v2282_v0  ;;  %1952 = vmatprep.subr.bf16.mxu1 %v2282_v0  ;;  %v386_v12 = vld [vmem:[%s2397_s19 + $0x14] sm:$0xf]  ;;  %v375_v13 = vld [vmem:[%s2407_s22 + $0x8] sm:$0xf]  ;;  %v376_v14 = vld [vmem:[%s2407_s22 + $0xc] sm:$0xf] }
  0x1e   : > { %v588_v15 = vsel %vm399_vm1, %v385_v11, 0  ;;  %v634_v16 = vsel %vm399_vm1, %v386_v12, 0  ;;  %v387_v17 = vld [vmem:[%s2397_s19 + $0x18] sm:$0xf]  ;;  %v388_v18 = vld [vmem:[%s2397_s19 + $0x1c] sm:$0xf] }
  0x1f   : > { %v377_v19 = vld [vmem:[%s2407_s22 + $0x10] sm:$0xf]  ;;  %v378_v20 = vld [vmem:[%s2407_s22 + $0x14] sm:$0xf]  ;;  %v680_v21 = vsel %vm399_vm1, %v387_v17, 0  ;;  %v726_v22 = vsel %vm399_vm1, %v388_v18, 0 }
  0x20   : > { %v379_v23 = vld [vmem:[%s2407_s22 + $0x18] sm:$0xf]  ;;  %v380_v24 = vld [vmem:[%s2407_s22 + $0x1c] sm:$0xf]  ;;  %s1843_s16 = sshll.u32 %s2521_s15, 6  ;;  %s2284_s19 = smov [#allocation4]  }
  0x21   : > { %s2525_s17 = scalar_lea.vmem [#allocation4], %s1843_s16  ;;  %s1658_s16 = scalar_lea.sflag [#allocation5], %s2521_s15 }
  0x22   : > { %s1686_s23 = sshll.u32 %s2525_s17, 4  ;;  %s2178_s20 = sshll.u32 %s2284_s19, 4  ;;  %s2641_s23 = int_to_ptr.vmem [resolvable:$true] %s1686_s23  ;;  %s2179_s20 = int_to_ptr.vmem [resolvable:$false] %s2178_s20 }
  0x23   : > { %1937 = vmatmul.mubr.msk.bf16.vlgmr.msra.gmra.mxu0 %vm399_vm1, %v373_v7  ;;  %1943 = vmatmul.mubr.msk.bf16.vlgmr.msra.gmra.mxu1 %vm399_vm1, %v374_v8  ;;  %s2174_s18 = scalar_lea.vmem %s2641_s23, 1024  ;;  %p2181_p1 = scmp.lt.s32.totalorder %s2641_s23, %s2179_s20 }
  0x24   : > { %1947 = vmatpush3.bf16.xpose.msra.mxu0 %v496_v9  ;;  %1953 = vmatpush3.bf16.xpose.msra.mxu1 %v542_v10  ;;  %p2175_p12 = scmp.ne.s32.totalorder %s2641_s23, %s2174_s18 }
  0x25   : > { %1948 = vmatprep.mubr.msk.bf16.mxu0 %vm2283_vm0, %v2282_v0  ;;  %1954 = vmatprep.mubr.msk.bf16.mxu1 %vm2283_vm0, %v2282_v0 }
  0x26   : > { %1958 = vmatprep.subr.bf16.mxu0 %v2282_v0  ;;  %1964 = vmatprep.subr.bf16.mxu1 %v2282_v0  ;;  %p2176_p13 = pnand %p2175_p12, %p2368_p4 }
  0x28   : > { %p2177_p0 = pneg %p2176_p13 }
  0x2b   : > { %1949 = vmatmul.mubr.msk.bf16.vlgmr.msra.gmra.mxu0 %vm399_vm1, %v375_v13  ;;  %1955 = vmatmul.mubr.msk.bf16.vlgmr.msra.gmra.mxu1 %vm399_vm1, %v376_v14 }
  0x2c   : > { %1959 = vmatpush3.bf16.xpose.msra.mxu0 %v588_v15  ;;  %1965 = vmatpush3.bf16.xpose.msra.mxu1 %v634_v16 }
  0x2d   : > { %1960 = vmatprep.mubr.msk.bf16.mxu0 %vm2283_vm0, %v2282_v0  ;;  %1966 = vmatprep.mubr.msk.bf16.mxu1 %vm2283_vm0, %v2282_v0 }
  0x2e   : > { %1970 = vmatprep.subr.bf16.mxu0 %v2282_v0  ;;  %1976 = vmatprep.subr.bf16.mxu1 %v2282_v0 }
  0x33   : > { %1961 = vmatmul.mubr.msk.bf16.vlgmr.msra.gmra.mxu0 %vm399_vm1, %v377_v19  ;;  %1967 = vmatmul.mubr.msk.bf16.vlgmr.msra.gmra.mxu1 %vm399_vm1, %v378_v20 }
  0x34   : > { %1971 = vmatpush3.bf16.xpose.msra.mxu0 %v680_v21  ;;  %1977 = vmatpush3.bf16.xpose.msra.mxu1 %v726_v22 }
  0x35   : > { %1972 = vmatprep.mubr.msk.bf16.mxu0 %vm2283_vm0, %v2282_v0  ;;  %1978 = vmatprep.mubr.msk.bf16.mxu1 %vm2283_vm0, %v2282_v0 }
  0x36   : > { %1982 = vmatprep.subr.bf16.mxu0 %v2282_v0  ;;  %1988 = vmatprep.subr.bf16.mxu1 %v2282_v0 }
  0x3b   : > { %1973 = vmatmul.mubr.msk.bf16.vlgmr.msra.gmra.mxu0 %vm399_vm1, %v379_v23  ;;  %1979 = vmatmul.mubr.msk.bf16.vlgmr.msra.gmra.mxu1 %vm399_vm1, %v380_v24 }
  0x3c   : > { %1984 = vmatprep.mubr.msk.bf16.mxu0 %vm2283_vm0, %v2282_v0  ;;  %1990 = vmatprep.mubr.msk.bf16.mxu1 %vm2283_vm0, %v2282_v0 }
  0xe3   : > { %v440_v27 = vpop.f32.mrf.mxu0  ;;  %v486_v28 = vpop.f32.mrf.mxu1 }
  0xe4   : > { %v441_v29 = vadd.f32 %v440_v27, %v398_v26  ;;  %v487_v30 = vadd.f32 %v486_v28, %v398_v26 }
  0xe5   : > { %v1938_v31 = vpop.f32.mrf.mxu0  ;;  %v1944_v32 = vpop.f32.mrf.mxu1 }
  0xe6   : > { %v769_v33 = vsel %vm768_vm2, %v441_v29, -inf  ;;  %v772_v36 = vsel %vm768_vm2, %v487_v30, -inf }
  0xe7   : > { %v489_v34 = vpop.f32.mrf.mxu1  ;;  %770 = vmax.xlane.f32.xlu0 %v769_v33  ;;  %v443_v35 = vpop.f32.mrf.mxu0 }
  0xe9   : > { %v1939_v37 = vpop.f32.mrf.mxu0  ;;  %v1945_v38 = vpop.f32.mrf.mxu1 }
  0xeb   : > { %v578_v39 = vpop.f32.mrf.mxu1  ;;  %773 = vmax.xlane.f32.xlu0 %v772_v36  ;;  %v532_v40 = vpop.f32.mrf.mxu0 }
  0xec   : > { %v579_v41 = vadd.f32 %v578_v39, %v398_v26  ;;  %v533_v42 = vadd.f32 %v532_v40, %v398_v26 }
  0xed   : > { %v1950_v43 = vpop.f32.mrf.mxu0  ;;  %v1956_v44 = vpop.f32.mrf.mxu1 }
  0xee   : > { %v775_v45 = vsel %vm768_vm2, %v533_v42, -inf  ;;  %v778_v48 = vsel %vm768_vm2, %v579_v41, -inf }
  0xef   : > { %v581_v46 = vpop.f32.mrf.mxu1  ;;  %776 = vmax.xlane.f32.xlu1 %v775_v45  ;;  %v535_v47 = vpop.f32.mrf.mxu0 }
  0xf1   : > { %v1951_v49 = vpop.f32.mrf.mxu0  ;;  %v1957_v50 = vpop.f32.mrf.mxu1 }
  0xf3   : > { %v670_v51 = vpop.f32.mrf.mxu1  ;;  %779 = vmax.xlane.f32.xlu1 %v778_v48  ;;  %v624_v52 = vpop.f32.mrf.mxu0 }
  0xf4   : > { %v671_v53 = vadd.f32 %v670_v51, %v398_v26  ;;  %v625_v54 = vadd.f32 %v624_v52, %v398_v26  ;;  %v389_v51 = vld [vmem:[%s367_s12] sm:$0xf]  ;;  %v390_v52 = vld [vmem:[%s367_s12 + $0x4] sm:$0xf] }
  0xf5   : > { %v1962_v55 = vpop.f32.mrf.mxu0  ;;  %v1968_v56 = vpop.f32.mrf.mxu1 }
  0xf6   : > { %v784_v57 = vsel %vm768_vm2, %v671_v53, -inf  ;;  %v781_v58 = vsel %vm768_vm2, %v625_v54, -inf  ;;  %v924_v55 = vsel %vm876_vm3, %v390_v52, 0  ;;  %v391_v56 = vld [vmem:[%s367_s12 + $0x8] sm:$0xf] }
  0xf7   : > { %v673_v59 = vpop.f32.mrf.mxu1  ;;  %785 = vmax.xlane.f32.xlu1 %v784_v57  ;;  %782 = vmax.xlane.f32.xlu0 %v781_v58  ;;  %v627_v60 = vpop.f32.mrf.mxu0  ;;  %v970_v57 = vsel %vm876_vm3, %v391_v56, 0  ;;  %v392_v58 = vld [vmem:[%s367_s12 + $0xc] sm:$0xf] }
  0xf8   : > { %1989 = vmatpush3.bf16.msra.mxu1 %v924_v55  ;;  %v1016_v59 = vsel %vm876_vm3, %v392_v58, 0  ;;  %v393_v60 = vld [vmem:[%s367_s12 + $0x10] sm:$0xf] }
  0xf9   : > { %v1963_v61 = vpop.f32.mrf.mxu0  ;;  %v1969_v62 = vpop.f32.mrf.mxu1  ;;  %2000 = vmatprep.subr.bf16.mxu1 %v2282_v0 }
  0xfa   : > { %v1062_v61 = vsel %vm876_vm3, %v393_v60, 0  ;;  %v394_v62 = vld [vmem:[%s367_s12 + $0x14] sm:$0xf]  ;;  %v1255_v60 = vld [vmem:[%s2733_s4 + $0xa] sm:$0x3] }
  0xfb   : > { %v716_v63 = vpop.f32.mrf.mxu0  ;;  %v762_v1 = vpop.f32.mrf.mxu1 }
  0xfc   : > { %v717_v2 = vadd.f32 %v716_v63, %v398_v26  ;;  %v763_v3 = vadd.f32 %v762_v1, %v398_v26  ;;  %v1108_v63 = vsel %vm876_vm3, %v394_v62, 0  ;;  %v395_v1 = vld [vmem:[%s367_s12 + $0x18] sm:$0xf] }
  0xfd   : > { %v1974_v4 = vpop.f32.mrf.mxu0  ;;  %v1980_v5 = vpop.f32.mrf.mxu1 }
  0xfe   : > { %v790_v6 = vsel %vm768_vm2, %v763_v3, -inf  ;;  %v787_v7 = vsel %vm768_vm2, %v717_v2, -inf }
  0xff   : > { %v765_v8 = vpop.f32.mrf.mxu1  ;;  %791 = vmax.xlane.f32.xlu1 %v790_v6  ;;  %788 = vmax.xlane.f32.xlu0 %v787_v7  ;;  %v719_v9 = vpop.f32.mrf.mxu0 }
 0x101   : > { %v1975_v10 = vpop.f32.mrf.mxu0  ;;  %v1981_v11 = vpop.f32.mrf.mxu1 }
 0x170   : > { %v771_v12 = vpop.xlane.xlu0 %770 }
 0x171   : > { %v793_v13 = vsub.f32 %v441_v29, %v771_v12 }
 0x173   : > { %v801_v14 = vmul.f32 1.442695, %v793_v13 }
 0x174   : > { %v774_v15 = vpop.xlane.xlu0 %773 }
 0x175   : > { %2142 = vpow2.f32 %v801_v14  ;;  %v794_v16 = vsub.f32 %v487_v30, %v774_v15 }
 0x177   : > { %v803_v17 = vmul.f32 1.442695, %v794_v16 }
 0x178   : > { %v777_v18 = vpop.xlane.xlu1 %776 }
 0x179   : > { %2144 = vpow2.f32 %v803_v17  ;;  %v795_v19 = vsub.f32 %v533_v42, %v777_v18 }
 0x17b   : > { %v805_v20 = vmul.f32 1.442695, %v795_v19 }
 0x17c   : > { %v780_v21 = vpop.xlane.xlu1 %779 }
 0x17d   : > { %2146 = vpow2.f32 %v805_v20  ;;  %v796_v22 = vsub.f32 %v579_v41, %v780_v21 }
 0x17f   : > { %v807_v23 = vmul.f32 1.442695, %v796_v22 }
 0x180   : > { %v786_v24 = vpop.xlane.xlu1 %785  ;;  %v783_v25 = vpop.xlane.xlu0 %782 }
 0x181   : > { %2148 = vpow2.f32 %v807_v23  ;;  %v798_v26 = vsub.f32 %v671_v53, %v786_v24  ;;  %v797_v27 = vsub.f32 %v625_v54, %v783_v25  ;;  %v878_v54 = vsel %vm876_vm3, %v389_v51, 0 }
 0x182   : > { %v2472_v28 = vpop.eup %2142  ;;  %1983 = vmatpush3.bf16.msra.mxu0 %v878_v54 }
 0x183   : > { %v811_v29 = vmul.f32 1.442695, %v798_v26  ;;  %v809_v31 = vmul.f32 1.442695, %v797_v27  ;;  %v817_v30 = vsel %vm768_vm2, %v2472_v28, 0.0  ;;  %1994 = vmatprep.subr.bf16.mxu0 %v2282_v0 }
 0x184   : > { %818 = vadd.xlane.f32.xlu0 %v817_v30 }
 0x185   : > { %2150 = vpow2.f32 %v811_v29 }
 0x186   : > { %v2476_v32 = vpop.eup %2144  ;;  %2152 = vpow2.f32 %v809_v31 }
 0x187   : > { %v820_v33 = vsel %vm768_vm2, %v2476_v32, 0.0 }
 0x188   : > { %821 = vadd.xlane.f32.xlu1 %v820_v33  ;;  %v792_v34 = vpop.xlane.xlu1 %791  ;;  %v789_v35 = vpop.xlane.xlu0 %788 }
 0x189   : > { %v800_v36 = vsub.f32 %v763_v3, %v792_v34  ;;  %v799_v37 = vsub.f32 %v717_v2, %v789_v35  ;;  %v1154_v2 = vsel %vm876_vm3, %v395_v1, 0  ;;  %v396_v3 = vld [vmem:[%s367_s12 + $0x1c] sm:$0xf]  ;;  %v1250_v34 = vld [vmem:[%s2733_s4] sm:$0x3]  ;;  %v1493_v1 = vsel %vm1261_vm4, %v1255_v60, 0  ;;  %s2646_s12 = scalar_lea.hbm %s2736_s7, %s1885_s30 }
 0x18a   : > { %v2480_v38 = vpop.eup %2146  ;;  %v2518_v4 = vsel %vm876_vm3, %v396_v3, 0 }
 0x18b   : > { %v815_v39 = vmul.f32 1.442695, %v800_v36  ;;  %v813_v40 = vmul.f32 1.442695, %v799_v37  ;;  %v823_v41 = vsel %vm768_vm2, %v2480_v38, 0.0  ;;  %v1263_v37 = vsel %vm1261_vm4, %v1250_v34, 0 }
 0x18c   : > { %824 = vadd.xlane.f32.xlu0 %v823_v41  ;;  %v1252_v41 = vld [vmem:[%s2733_s4 + $0x4] sm:$0x3] }
 0x18d   : > { %2154 = vpow2.f32 %v815_v39  ;;  %v1251_v39 = vld [vmem:[%s2733_s4 + $0x2] sm:$0x3] }
 0x18e   : > { %v2484_v42 = vpop.eup %2148  ;;  %2156 = vpow2.f32 %v813_v40  ;;  %v1309_v40 = vsel %vm1261_vm4, %v1251_v39, 0 }
 0x18f   : > { %v826_v43 = vsel %vm768_vm2, %v2484_v42, 0.0 }
 0x190   : > { %827 = vadd.xlane.f32.xlu1 %v826_v43 }
 0x192   : > { %v2488_v44 = vpop.eup %2150 }
 0x193   : > { %v2490_v45 = vpop.eup %2152  ;;  %v832_v46 = vsel %vm768_vm2, %v2488_v44, 0.0 }
 0x194   : > { %833 = vadd.xlane.f32.xlu1 %v832_v46  ;;  %v829_v47 = vsel %vm768_vm2, %v2490_v45, 0.0  ;;  %v1253_v46 = vld [vmem:[%s2733_s4 + $0x6] sm:$0x3] }
 0x195   : > { %830 = vadd.xlane.f32.xlu0 %v829_v47 }
 0x19a   : > { %v2496_v48 = vpop.eup %2154 }
 0x19b   : > { %v2502_v49 = vpop.eup %2156  ;;  %v838_v50 = vsel %vm768_vm2, %v2496_v48, 0.0 }
 0x19c   : > { %839 = vadd.xlane.f32.xlu1 %v838_v50  ;;  %v835_v53 = vsel %vm768_vm2, %v2502_v49, 0.0  ;;  %v1401_v50 = vsel %vm1261_vm4, %v1253_v46, 0 }
 0x19d   : > { %836 = vadd.xlane.f32.xlu0 %v835_v53  ;;  %v1254_v53 = vld [vmem:[%s2733_s4 + $0x8] sm:$0x3] }
 0x20d   : > { %v819_v5 = vpop.xlane.xlu0 %818 }
 0x20e   : > { %2158 = vrcp.f32 %v819_v5 }
 0x211   : > { %v822_v6 = vpop.xlane.xlu1 %821 }
 0x212   : > { %2160 = vrcp.f32 %v822_v6 }
 0x215   : > { %v825_v7 = vpop.xlane.xlu0 %824 }
 0x216   : > { %2162 = vrcp.f32 %v825_v7 }
 0x219   : > { %v828_v8 = vpop.xlane.xlu1 %827 }
 0x21a   : > { %2164 = vrcp.f32 %v828_v8 }
 0x21b   : > { %v2159_v9 = vpop.eup %2158 }
 0x21c   : > { %v849_v10 = vmul.f32 %v2159_v9, %v2472_v28 }
 0x21d   : > { %v834_v11 = vpop.xlane.xlu1 %833 }
 0x21e   : > { %2166 = vrcp.f32 %v834_v11  ;;  %v831_v12 = vpop.xlane.xlu0 %830  ;;  %v865_v13 = vpack.c.bf16 %v849_v10, %v849_v10  ;;  %857 = vst.msk [vmem:[%s2525_s17] sm:$0xff] %vm768_vm2, %v849_v10  ;;  %v1257_v10 = vld [vmem:[%s2733_s4 + $0xe] sm:$0x3] }
 0x21f   : > { %v2161_v14 = vpop.eup %2160  ;;  %2168 = vrcp.f32 %v831_v12 }
 0x220   : > { %1985 = vmatmul.mubr.msk.bf16.vlgmr.msra.gmra.mxu0 %vm768_vm2, %v865_v13  ;;  %v850_v15 = vmul.f32 %v2161_v14, %v2476_v32 }
 0x221   : > { %1995 = vmatpush3.bf16.msra.mxu0 %v970_v57  ;;  %1996 = vmatprep.mubr.msk.bf16.mxu0 %vm2283_vm0, %v2282_v0  ;;  %v1447_v57 = vsel %vm1261_vm4, %v1254_v53, 0 }
 0x222   : > { %v866_v16 = vpack.c.bf16 %v850_v15, %v850_v15  ;;  %2006 = vmatprep.subr.bf16.mxu0 %v2282_v0  ;;  %858 = vst.msk [vmem:[%s2525_s17 + $0x8] sm:$0xff] %vm768_vm2, %v850_v15  ;;  %v1585_v15 = vsel %vm1261_vm4, %v1257_v10, 0 }
 0x223   : > { %v2163_v17 = vpop.eup %2162 }
 0x224   : > { %1991 = vmatmul.mubr.msk.bf16.vlgmr.msra.gmra.mxu1 %vm768_vm2, %v866_v16  ;;  %v851_v18 = vmul.f32 %v2163_v17, %v2480_v38 }
 0x225   : > { %2001 = vmatpush3.bf16.msra.mxu1 %v1016_v59  ;;  %v840_v19 = vpop.xlane.xlu1 %839  ;;  %2002 = vmatprep.mubr.msk.bf16.mxu1 %vm2283_vm0, %v2282_v0 }
 0x226   : > { %2170 = vrcp.f32 %v840_v19  ;;  %v837_v20 = vpop.xlane.xlu0 %836  ;;  %v867_v21 = vpack.c.bf16 %v851_v18, %v851_v18  ;;  %2012 = vmatprep.subr.bf16.mxu1 %v2282_v0  ;;  %859 = vst.msk [vmem:[%s2525_s17 + $0x10] sm:$0xff] %vm768_vm2, %v851_v18 }
 0x227   : > { %v2165_v22 = vpop.eup %2164  ;;  %2172 = vrcp.f32 %v837_v20 }
 0x228   : > { %1997 = vmatmul.mubr.msk.bf16.vlgmr.msra.gmra.mxu0 %vm768_vm2, %v867_v21  ;;  %v852_v23 = vmul.f32 %v2165_v22, %v2484_v42 }
 0x229   : > { %2007 = vmatpush3.bf16.msra.mxu0 %v1062_v61  ;;  %2008 = vmatprep.mubr.msk.bf16.mxu0 %vm2283_vm0, %v2282_v0 }
 0x22a   : > { %v868_v24 = vpack.c.bf16 %v852_v23, %v852_v23  ;;  %2018 = vmatprep.subr.bf16.mxu0 %v2282_v0  ;;  %860 = vst.msk [vmem:[%s2525_s17 + $0x18] sm:$0xff] %vm768_vm2, %v852_v23 }
 0x22b   : > { %v2167_v25 = vpop.eup %2166 }
 0x22c   : > { %v2169_v26 = vpop.eup %2168  ;;  %2003 = vmatmul.mubr.msk.bf16.vlgmr.msra.gmra.mxu1 %vm768_vm2, %v868_v24  ;;  %v854_v27 = vmul.f32 %v2167_v25, %v2488_v44  ;;  %v1355_v44 = vsel %vm1261_vm4, %v1252_v41, 0 }
 0x22d   : > { %2013 = vmatpush3.bf16.msra.mxu1 %v1108_v63  ;;  %v853_v28 = vmul.f32 %v2169_v26, %v2490_v45  ;;  %2014 = vmatprep.mubr.msk.bf16.mxu1 %vm2283_vm0, %v2282_v0 }
 0x22e   : > { %2024 = vmatprep.subr.bf16.mxu1 %v2282_v0  ;;  %862 = vst.msk [vmem:[%s2525_s17 + $0x28] sm:$0xff] %vm768_vm2, %v854_v27  ;;  %v870_v31 = vpack.c.bf16 %v854_v27, %v854_v27 }
 0x22f   : > { %v869_v29 = vpack.c.bf16 %v853_v28, %v853_v28  ;;  %861 = vst.msk [vmem:[%s2525_s17 + $0x20] sm:$0xff] %vm768_vm2, %v853_v28 }
 0x231   : > { %2009 = vmatmul.mubr.msk.bf16.vlgmr.msra.gmra.mxu0 %vm768_vm2, %v869_v29 }
 0x232   : > { %2019 = vmatpush3.bf16.msra.mxu0 %v1154_v2  ;;  %2020 = vmatprep.mubr.msk.bf16.mxu0 %vm2283_vm0, %v2282_v0 }
 0x233   : > { %v2171_v30 = vpop.eup %2170  ;;  %2030 = vmatprep.subr.bf16.mxu0 %v2282_v0 }
 0x234   : > { %v2173_v32 = vpop.eup %2172  ;;  %v856_v33 = vmul.f32 %v2171_v30, %v2496_v48  ;;  %2015 = vmatmul.mubr.msk.bf16.vlgmr.msra.gmra.mxu1 %vm768_vm2, %v870_v31 }
 0x235   : > { %v855_v35 = vmul.f32 %v2173_v32, %v2502_v49  ;;  %2025 = vmatpush3.bf16.msra.mxu1 %v2518_v4  ;;  %2026 = vmatprep.mubr.msk.bf16.mxu1 %vm2283_vm0, %v2282_v0  ;;  %v1256_v4 = vld [vmem:[%s2733_s4 + $0xc] sm:$0x3] }
 0x236   : > { %2036 = vmatprep.subr.bf16.mxu1 %v2282_v0  ;;  %864 = vst.msk [vmem:[%s2525_s17 + $0x38] sm:$0xff] %vm768_vm2, %v856_v33  ;;  %v872_v38 = vpack.c.bf16 %v856_v33, %v856_v33  ;;  %v1539_v9 = vsel %vm1261_vm4, %v1256_v4, 0 }
 0x237   : > { %v871_v36 = vpack.c.bf16 %v855_v35, %v855_v35  ;;  %863 = vst.msk [vmem:[%s2525_s17 + $0x30] sm:$0xff] %vm768_vm2, %v855_v35  ;;  %s2180_s17 = scalar_lea.vmem %s2179_s20, 2048 }
 0x238   : > { %p2182_p2 = scmp.lt.s32.totalorder %s2180_s17, %s2174_s18 }
 0x239   : > { %2021 = vmatmul.mubr.msk.bf16.vlgmr.msra.gmra.mxu0 %vm768_vm2, %v871_v36 }
 0x23a   : > { %2031 = vmatpush3.bf16.msra.mxu0 %v1263_v37  ;;  %2032 = vmatprep.mubr.msk.bf16.mxu0 %vm2283_vm0, %v2282_v0  ;;  %p2183_p3 = por %p2182_p2, %p2181_p1 }
 0x23b   : > { %2042 = vmatprep.subr.bf16.mxu0 %v2282_v0 }
 0x23c   : > { %2027 = vmatmul.mubr.msk.bf16.vlgmr.msra.gmra.mxu1 %vm768_vm2, %v872_v38  ;;  %p2184_p5 = pnand %p2183_p3, %p2177_p0 }
 0x23d   : > { %2038 = vmatprep.mubr.msk.bf16.mxu1 %vm2283_vm0, %v2282_v0  ;;  %2037 = vmatpush3.bf16.msra.mxu1 %v1309_v40 }
 0x23e   : > { %2048 = vmatprep.subr.bf16.mxu1 %v2282_v0 }
 0x2e0   : > { %v914_v42 = vpop.f32.mrf.mxu0 }
 0x2e1   : > { %v1242_v43 = vpack.c.bf16 %v914_v42, %v914_v42 }
 0x2e2   : > { %v1986_v45 = vpop.f32.mrf.mxu0 }
 0x2e3   : > { %2033 = vmatmul.mubr.msk.bf16.vlgmr.msra.gmra.mxu0 %vm399_vm1, %v1242_v43 }
 0x2e4   : > { %v917_v47 = vpop.f32.mrf.mxu0  ;;  %v960_v48 = vpop.f32.mrf.mxu1  ;;  %2043 = vmatpush3.bf16.msra.mxu0 %v1355_v44  ;;  %2044 = vmatprep.mubr.msk.bf16.mxu0 %vm2283_vm0, %v2282_v0 }
 0x2e5   : > { %v1243_v49 = vpack.c.bf16 %v960_v48, %v960_v48  ;;  %2054 = vmatprep.subr.bf16.mxu0 %v2282_v0 }
 0x2e6   : > { %v1987_v51 = vpop.f32.mrf.mxu0  ;;  %v1992_v52 = vpop.f32.mrf.mxu1 }
 0x2e7   : > { %2039 = vmatmul.mubr.msk.bf16.vlgmr.msra.gmra.mxu1 %vm399_vm1, %v1243_v49 }
 0x2e8   : > { %v963_v54 = vpop.f32.mrf.mxu1  ;;  %v1006_v55 = vpop.f32.mrf.mxu0  ;;  %2049 = vmatpush3.bf16.msra.mxu1 %v1401_v50  ;;  %2050 = vmatprep.mubr.msk.bf16.mxu1 %vm2283_vm0, %v2282_v0 }
 0x2e9   : > { %v1244_v56 = vpack.c.bf16 %v1006_v55, %v1006_v55  ;;  %2060 = vmatprep.subr.bf16.mxu1 %v2282_v0 }
 0x2ea   : > { %v1993_v58 = vpop.f32.mrf.mxu1  ;;  %v1998_v59 = vpop.f32.mrf.mxu0 }
 0x2eb   : > { %2045 = vmatmul.mubr.msk.bf16.vlgmr.msra.gmra.mxu0 %vm399_vm1, %v1244_v56 }
 0x2ec   : > { %v1009_v61 = vpop.f32.mrf.mxu0  ;;  %v1052_v62 = vpop.f32.mrf.mxu1  ;;  %2055 = vmatpush3.bf16.msra.mxu0 %v1447_v57  ;;  %2056 = vmatprep.mubr.msk.bf16.mxu0 %vm2283_vm0, %v2282_v0 }
 0x2ed   : > { %v1245_v63 = vpack.c.bf16 %v1052_v62, %v1052_v62  ;;  %2066 = vmatprep.subr.bf16.mxu0 %v2282_v0 }
 0x2ee   : > { %v1999_v2 = vpop.f32.mrf.mxu0  ;;  %v2004_v3 = vpop.f32.mrf.mxu1 }
 0x2ef   : > { %2051 = vmatmul.mubr.msk.bf16.vlgmr.msra.gmra.mxu1 %vm399_vm1, %v1245_v63 }
 0x2f0   : > { %v1055_v5 = vpop.f32.mrf.mxu1  ;;  %2061 = vmatpush3.bf16.msra.mxu1 %v1493_v1  ;;  %2062 = vmatprep.mubr.msk.bf16.mxu1 %vm2283_vm0, %v2282_v0 }
 0x2f1   : > { %v1098_v6 = vpop.f32.mrf.mxu0  ;;  %2072 = vmatprep.subr.bf16.mxu1 %v2282_v0 }
 0x2f2   : > { %v1246_v7 = vpack.c.bf16 %v1098_v6, %v1098_v6  ;;  %v2005_v8 = vpop.f32.mrf.mxu1 }
 0x2f3   : > { %v2010_v11 = vpop.f32.mrf.mxu0 }
 0x2f4   : > { %2057 = vmatmul.mubr.msk.bf16.vlgmr.msra.gmra.mxu0 %vm399_vm1, %v1246_v7  ;;  %v1144_v12 = vpop.f32.mrf.mxu1 }
 0x2f5   : > { %v1101_v13 = vpop.f32.mrf.mxu0  ;;  %v1247_v14 = vpack.c.bf16 %v1144_v12, %v1144_v12  ;;  %2067 = vmatpush3.bf16.msra.mxu0 %v1539_v9  ;;  %2068 = vmatprep.mubr.msk.bf16.mxu0 %vm2283_vm0, %v2282_v0 }
 0x2f6   : > { %v2016_v16 = vpop.f32.mrf.mxu1 }
 0x2f7   : > { %v2011_v17 = vpop.f32.mrf.mxu0  ;;  %2063 = vmatmul.mubr.msk.bf16.vlgmr.msra.gmra.mxu1 %vm399_vm1, %v1247_v14 }
 0x2f8   : > { %v1147_v18 = vpop.f32.mrf.mxu1  ;;  %2073 = vmatpush3.bf16.msra.mxu1 %v1585_v15  ;;  %2074 = vmatprep.mubr.msk.bf16.mxu1 %vm2283_vm0, %v2282_v0 }
 0x2f9   : > { %v1190_v19 = vpop.f32.mrf.mxu0 }
 0x2fa   : > { %v1248_v20 = vpack.c.bf16 %v1190_v19, %v1190_v19  ;;  %v2017_v21 = vpop.f32.mrf.mxu1 }
 0x2fb   : > { %v2022_v22 = vpop.f32.mrf.mxu0 }
 0x2fc   : > { %2069 = vmatmul.mubr.msk.bf16.vlgmr.msra.gmra.mxu0 %vm399_vm1, %v1248_v20  ;;  %v1236_v23 = vpop.f32.mrf.mxu1 }
 0x2fd   : > { %v1193_v24 = vpop.f32.mrf.mxu0  ;;  %v1249_v25 = vpack.c.bf16 %v1236_v23, %v1236_v23 }
 0x2fe   : > { %v2028_v26 = vpop.f32.mrf.mxu1 }
 0x2ff   : > { %v2023_v27 = vpop.f32.mrf.mxu0  ;;  %2075 = vmatmul.mubr.msk.bf16.vlgmr.msra.gmra.mxu1 %vm399_vm1, %v1249_v25 }
 0x300   : > { %v1239_v28 = vpop.f32.mrf.mxu1 }
 0x302   : > { %v2029_v29 = vpop.f32.mrf.mxu1 }
 0x303   : > { %2187 = shalt.err (!%p2184_p5)
}
 0x304   : > { %s2188_s21 = scalar_lea.hbm %s2646_s12, 1024  ;;  %s2192_s8 = scalar_lea.hbm %s2736_s7, 2048 }
 0x305   : > { %p2189_p6 = scmp.ne.s32.totalorder %s2646_s12, %s2188_s21  ;;  %p2193_p10 = scmp.lt.s32.totalorder %s2646_s12, %s2736_s7 }
 0x306   : > { %p2194_p11 = scmp.lt.s32.totalorder %s2192_s8, %s2188_s21 }
 0x307   : > { %p2190_p7 = pnand %p2189_p6, %p2368_p4 }
 0x308   : > { %p2195_p12 = por %p2194_p11, %p2193_p10 }
 0x309   : > { %p2191_p9 = pneg %p2190_p7 }
 0x30b   : > { %p2196_p13 = pnand %p2195_p12, %p2191_p9 }
 0x30d   : > { %2199 = shalt.err (!%p2196_p13)
}
 0x30e   : > { %s2285_s18 = smov 128   ;;  %s2286_s20 = smov 8   ;;  %vm1627_vm5 = vcmask 261120   ;;  %v1874_v8 = vld [vmem:[%s2734_s5] ss:$0 sm:$0xff] }
 0x30f   : > { %2079 = dma.vmem_to_hbm [thread:$0]  (%p2368_p4), %s2641_s23, 1024, %s2646_s12, %s1658_s16, %s2285_s18, %s2285_s18, %s2286_s20  }
 0x310   : > { %s1842_s23 = sshll.u32 %s2521_s15, 3  ;;  %s1877_s17 = sshll.u32 %s2272_s27, 7 }
 0x311   : > { %s342_s21 = scalar_lea.vmem [#allocation2], %s1842_s23  ;;  %s2687_s10 = scalar_lea.hbm %s2735_s6, %s1877_s17 }
 0x312   : > { %s1672_s22 = sshll.u32 %s342_s21, 4  ;;  %s1653_s19 = scalar_lea.sflag [#allocation3], %s2521_s15  ;;  %s1673_s22 = int_to_ptr.vmem [resolvable:$true] %s1672_s22 }
 0x313   : > { %s2200_s18 = scalar_lea.vmem %s1673_s22, 128  ;;  %s2287_s27 = smov [#allocation2]  }
 0x314   : > { %p2201_p0 = scmp.ne.s32.totalorder %s1673_s22, %s2200_s18  ;;  %s2204_s20 = sshll.u32 %s2287_s27, 4  ;;  %s2205_s20 = int_to_ptr.vmem [resolvable:$false] %s2204_s20 }
 0x315   : > { %s2206_s23 = scalar_lea.vmem %s2205_s20, 256  ;;  %p2207_p3 = scmp.lt.s32.totalorder %s1673_s22, %s2205_s20 }
 0x316   : > { %p2202_p1 = pnand %p2201_p0, %p2368_p4  ;;  %p2208_p5 = scmp.lt.s32.totalorder %s2206_s23, %s2200_s18 }
 0x318   : > { %p2203_p2 = pneg %p2202_p1  ;;  %p2209_p6 = por %p2208_p5, %p2207_p3 }
 0x31a   : > { %p2210_p7 = pnand %p2209_p6, %p2203_p2 }
 0x3a3   : > { %v1299_v0 = vpop.f32.mrf.mxu0 }
 0x3a4   : > { %v1628_v45 = vsel %vm1627_vm5, %v1299_v0, 0.0 }
 0x3a5   : > { %v2034_v31 = vpop.f32.mrf.mxu0 }
 0x3a7   : > { %v1302_v30 = vpop.f32.mrf.mxu0  ;;  %v1345_v32 = vpop.f32.mrf.mxu1 }
 0x3a8   : > { %v1629_v43 = vsel %vm1627_vm5, %v1345_v32, 0.0 }
 0x3a9   : > { %v2035_v33 = vpop.f32.mrf.mxu0  ;;  %v2040_v34 = vpop.f32.mrf.mxu1  ;;  %v1630_v48 = vadd.f32 %v1629_v43, %v1628_v45 }
 0x3ab   : > { %v1348_v35 = vpop.f32.mrf.mxu1  ;;  %v1391_v36 = vpop.f32.mrf.mxu0 }
 0x3ac   : > { %v1631_v46 = vsel %vm1627_vm5, %v1391_v36, 0.0 }
 0x3ad   : > { %v2041_v37 = vpop.f32.mrf.mxu1  ;;  %v2046_v38 = vpop.f32.mrf.mxu0  ;;  %v1632_v52 = vadd.f32 %v1631_v46, %v1630_v48 }
 0x3af   : > { %v1394_v39 = vpop.f32.mrf.mxu0  ;;  %v1437_v40 = vpop.f32.mrf.mxu1 }
 0x3b0   : > { %v1633_v50 = vsel %vm1627_vm5, %v1437_v40, 0.0 }
 0x3b1   : > { %v2047_v41 = vpop.f32.mrf.mxu0  ;;  %v2052_v42 = vpop.f32.mrf.mxu1  ;;  %v1634_v56 = vadd.f32 %v1633_v50, %v1632_v52 }
 0x3b3   : > { %v1440_v44 = vpop.f32.mrf.mxu1 }
 0x3b4   : > { %v1483_v47 = vpop.f32.mrf.mxu0 }
 0x3b5   : > { %v2053_v49 = vpop.f32.mrf.mxu1  ;;  %v1635_v54 = vsel %vm1627_vm5, %v1483_v47, 0.0 }
 0x3b6   : > { %v2058_v51 = vpop.f32.mrf.mxu0  ;;  %v1636_v60 = vadd.f32 %v1635_v54, %v1634_v56 }
 0x3b7   : > { %v1529_v53 = vpop.f32.mrf.mxu1 }
 0x3b8   : > { %v1486_v55 = vpop.f32.mrf.mxu0  ;;  %v1637_v58 = vsel %vm1627_vm5, %v1529_v53, 0.0 }
 0x3b9   : > { %v2064_v57 = vpop.f32.mrf.mxu1  ;;  %v1638_v63 = vadd.f32 %v1637_v58, %v1636_v60 }
 0x3ba   : > { %v2059_v59 = vpop.f32.mrf.mxu0 }
 0x3bb   : > { %v1532_v61 = vpop.f32.mrf.mxu1 }
 0x3bc   : > { %v1575_v62 = vpop.f32.mrf.mxu0 }
 0x3bd   : > { %v1639_v1 = vsel %vm1627_vm5, %v1575_v62, 0.0  ;;  %v2065_v2 = vpop.f32.mrf.mxu1 }
 0x3be   : > { %v2070_v3 = vpop.f32.mrf.mxu0  ;;  %v1640_v4 = vadd.f32 %v1639_v1, %v1638_v63 }
 0x3bf   : > { %v1621_v5 = vpop.f32.mrf.mxu1 }
 0x3c0   : > { %v1578_v6 = vpop.f32.mrf.mxu0  ;;  %v1641_v7 = vsel %vm1627_vm5, %v1621_v5, 0.0 }
 0x3c1   : > { %v1642_v9 = vadd.f32 %v1641_v7, %v1640_v4  ;;  %v2076_v10 = vpop.f32.mrf.mxu1 }
 0x3c2   : > { %v2071_v11 = vpop.f32.mrf.mxu0 }
 0x3c3   : > { %v1650_v12 = vadd.f32 %v1874_v8, %v1642_v9  ;;  %v1624_v13 = vpop.f32.mrf.mxu1 }
 0x3c5   : > { %v2077_v14 = vpop.f32.mrf.mxu1  ;;  %1651 = vst.msk [vmem:[%s342_s21] sm:$0xff] %vm1627_vm5, %v1650_v12 }
 0x3c6   : > { %2213 = shalt.err (!%p2210_p7)
}
 0x3c7   : > { %s2214_s12 = scalar_lea.hbm %s2687_s10, 128  ;;  %s2218_s17 = scalar_lea.hbm %s2735_s6, 256 }
 0x3c8   : > { %p2215_p9 = scmp.ne.s32.totalorder %s2687_s10, %s2214_s12  ;;  %p2219_p12 = scmp.lt.s32.totalorder %s2687_s10, %s2735_s6 }
 0x3c9   : > { %p2220_p13 = scmp.lt.s32.totalorder %s2218_s17, %s2214_s12 }
 0x3ca   : > { %p2216_p10 = pnand %p2215_p9, %p2368_p4 }
 0x3cb   : > { %p2221_p0 = por %p2220_p13, %p2219_p12 }
 0x3cc   : > { %p2217_p11 = pneg %p2216_p10 }
 0x3ce   : > { %p2222_p1 = pnand %p2221_p0, %p2217_p11 }
 0x3d0   : > { %2225 = shalt.err (!%p2222_p1)
}
 0x3d1   : > { %2078 = dma.vmem_to_hbm [thread:$0]  (%p2368_p4), %s1673_s22, 128, %s2687_s10, %s1653_s19  }
 0x3d2 PF: > { %p2089_p2 = scmp.ge.s32.totalorder %s2280_s29, 2  ;;  %s1701_s8 = sand.u32 1, %s2260_s24  }
 0x3d3   : > { %s1702_s18 = scalar_lea.sflag [#allocation3], %s1701_s8 }
 0x3d4   : > { %p2083_p3 = pnand %p2089_p2, %p2375_p8 }
 0x3d6   : > { %p2084_p5 = pneg %p2083_p3 }
 0x3d8   : > { %2251 = dma.done.wait (%p2084_p5), %s1702_s18, 128  }
 0x3d9   : > { %2253 = vsyncadd (%p2084_p5), %s1702_s18, 4294967168  ;;  %s1711_s27 = scalar_lea.sflag [#allocation5], %s1701_s8 }
 0x3da   : > { %2255 = dma.done.wait (%p2084_p5), %s1711_s27, 1024  }
 0x3db   : > { %2257 = vsyncadd (%p2084_p5), %s1711_s27, 4294966272  ;;  %s24_s29 = sadd.s32 1, %s2280_s29   ;;  %s2739_s24 = smov %s2264_s25 }
 0x3dc   : > { %p21_p6 = scmp.ge.s32.totalorder %s24_s29, 4   ;;  %s2740_s25 = smov %s2268_s26 }
 0x3dd   : > { %s2741_s26 = smov %s2381_s14  ;;  %s2742_s27 = smov %s2276_s28 }
 0x3de   : > { %s2743_s28 = smov %s2745_s9  ;;  %23 = sbr.rel (!%p21_p6) target bundleno = 6 (0x6), region = 105 }
 0x3e3   :  { %1716 = vsyncpa [#allocation3], 1 }
 0x3e4   :  { %1718 = vsyncpa [#allocation3 + $0x1], 1 }
 0x3e5   :  { %1719 = vsyncpa [#allocation5], 1 }
 0x3e6   :  { %1721 = vsyncpa [#allocation5 + $0x1], 1 }

</bundles_post_ra>
